<compile_context>
chip_gen: v7x
topology: tpu7x:2x2x1
jax: 0.10.0
libtpu: 0.0.40
codegen_flags: <defaults>
</compile_context>

<pallas_src>
import numpy as np
import jax
import jax.numpy as jnp
from jax import lax
from jax.experimental import pallas as pl
from jax.experimental.pallas import tpu as pltpu

_EPS = 1e-12  # same eps as torch.nn.functional.normalize


def _round_up(a, b):
    return ((a + b - 1) // b) * b


def _make_arcface_kernel(apply_margin, m, s):
    """Unified kernel: cosine logits, optionally with the ArcFace margin epilogue."""
    s_cos_m = float(s * np.cos(m))
    s_sin_m = float(s * np.sin(m))
    s_f = float(s)

    def kernel(x_ref, w_ref, ixn_ref, iwn_ref, lab_ref, o_ref):
        # (TM, D) bf16 . (TN, D) bf16 -> (TM, TN) f32, contracting last dims (no .T).
        c = lax.dot_general(
            x_ref[...], w_ref[...],
            dimension_numbers=(((1,), (1,)), ((), ())),
            preferred_element_type=jnp.float32,
        )
        # Rank-1 scaling by precomputed inverse norms == cosine of normalized vectors.
        c = c * ixn_ref[...] * iwn_ref[...]          # (TM,1) and (1,TN) broadcast

        if not apply_margin:
            o_ref[...] = c.astype(o_ref.dtype)
            return

        c = jnp.clip(c, -1.0, 1.0)
        sin_t = jnp.sqrt(jnp.maximum(1.0 - c * c, 0.0))      # sin(acos(c)) >= 0
        phi_s = c * s_cos_m - sin_t * s_sin_m                 # s * cos(theta + m)

        tm, tn = c.shape
        # Global class ids for this C-tile (iota offset by the tile's column origin).
        col = pl.program_id(1) * tn + lax.broadcasted_iota(jnp.int32, (tm, tn), 1)
        onehot = col == lab_ref[...]                           # (TM,1) labels broadcast
        o_ref[...] = jnp.where(onehot, phi_s, c * s_f).astype(o_ref.dtype)

    return kernel


def arcface_forward(x, weight, m, s, labels=None, *, tm_max=256, tn_max=512):
    """Pallas ArcFace forward. x: [B, D], weight: [C, D], labels: [B] int or None."""
    B, D = x.shape
    C, D2 = weight.shape
    assert D == D2

    # --- host-side (XLA) preprocessing: norms in f32, bf16 feed for the MXU -------
    x32 = x.astype(jnp.float32)
    w32 = weight.astype(jnp.float32)
    # 1/max(||v||, eps) == rsqrt(max(||v||^2, eps^2))
    inv_xn = lax.rsqrt(jnp.maximum(jnp.sum(x32 * x32, axis=-1, keepdims=True),
                                   _EPS * _EPS))                     # (B, 1) f32
    inv_wn = lax.rsqrt(jnp.maximum(jnp.sum(w32 * w32, axis=-1),
                                   _EPS * _EPS))[None, :]            # (1, C) f32
    xq = x32.astype(jnp.bfloat16)
    wq = w32.astype(jnp.bfloat16)

    # --- tile sizes (128-lane aligned output; clamp to problem size) --------------
    TM = min(tm_max, _round_up(B, 8))
    TN = min(tn_max, _round_up(C, 128))
    B_pad = _round_up(B, TM)
    C_pad = _round_up(C, TN)
    # TODO(synk): K-tile D with a third ("arbitrary") grid axis if in_features is too
    # large for resident (TM, D)+(TN, D) tiles; not needed at these sizes.

    if B_pad != B:
        xq = jnp.pad(xq, ((0, B_pad - B), (0, 0)))
        inv_xn = jnp.pad(inv_xn, ((0, B_pad - B), (0, 0)))
    if C_pad != C:
        wq = jnp.pad(wq, ((0, C_pad - C), (0, 0)))
        inv_wn = jnp.pad(inv_wn, ((0, 0), (0, C_pad - C)))

    apply_margin = labels is not None
    if labels is None:
        # TODO(synk): the PyTorch print(labels)/print(x)/print(idxes) debug prints have
        # no kernel equivalent and are omitted.
        lab2 = jnp.zeros((B_pad, 1), jnp.int32)          # unused by the kernel
    else:
        lab2 = labels.astype(jnp.int32).reshape(B, 1)
        if B_pad != B:
            lab2 = jnp.pad(lab2, ((0, B_pad - B), (0, 0)), constant_values=-1)

    grid = (B_pad // TM, C_pad // TN)

    out = pl.pallas_call(
        _make_arcface_kernel(apply_margin, float(m), float(s)),
        out_shape=jax.ShapeDtypeStruct((B_pad, C_pad), jnp.float32),
        grid=grid,
        in_specs=[
            pl.BlockSpec((TM, D), lambda i, j: (i, 0)),   # x tile        (bf16)
            pl.BlockSpec((TN, D), lambda i, j: (j, 0)),   # weight tile   (bf16)
            pl.BlockSpec((TM, 1), lambda i, j: (i, 0)),   # 1/||x||       (f32)
            pl.BlockSpec((1, TN), lambda i, j: (0, j)),   # 1/||W||       (f32)
            pl.BlockSpec((TM, 1), lambda i, j: (i, 0)),   # labels        (int32)
        ],
        out_specs=pl.BlockSpec((TM, TN), lambda i, j: (i, j)),
        compiler_params=pltpu.CompilerParams(
            dimension_semantics=("parallel", "parallel")),
    )(xq, wq, inv_xn, inv_wn, lab2)

    return out[:B, :C]


# ----------------------------- references -------------------------------------
def _ref_forward(x, w, m, s, labels=None):
    """Pure-JAX f32 reference mirroring the PyTorch module literally."""
    xn = x / jnp.maximum(jnp.linalg.norm(x, axis=-1, keepdims=True), _EPS)
    wn = w / jnp.maximum(jnp.linalg.norm(w, axis=-1, keepdims=True), _EPS)
    c = xn @ wn.T
    if labels is None:
        return c
    c = jnp.clip(c, -1.0, 1.0)
    t = jnp.arccos(c)
    t = t + m * jax.nn.one_hot(labels, w.shape[0], dtype=t.dtype)
    return jnp.cos(t) * s


def _ref_forward_quant(x, w, m, s, labels=None):
    """Reference with the same bf16 MXU feed + post-scaling as the kernel (tight check)."""
    inv_xn = lax.rsqrt(jnp.maximum(jnp.sum(x * x, -1, keepdims=True), _EPS * _EPS))
    inv_wn = lax.rsqrt(jnp.maximum(jnp.sum(w * w, -1), _EPS * _EPS))[None, :]
    xq = x.astype(jnp.bfloat16).astype(jnp.float32)
    wq = w.astype(jnp.bfloat16).astype(jnp.float32)
    c = (xq @ wq.T) * inv_xn * inv_wn
    if labels is None:
        return c
    c = jnp.clip(c, -1.0, 1.0)
    sin_t = jnp.sqrt(jnp.maximum(1.0 - c * c, 0.0))
    phi = c * np.cos(m) - sin_t * np.sin(m)
    onehot = jax.nn.one_hot(labels, w.shape[0], dtype=bool)
    return jnp.where(onehot, phi, c) * s


if __name__ == "__main__":
    m, s = 0.5, 30.0
    key = jax.random.PRNGKey(0)

    # case 1: single-tile grid; case 2: multi-tile (3x3) grid exercising iota offsets.
    cases = [
        (8, 32, 16, 256, 512),
        (24, 64, 300, 8, 128),
    ]

    for (B, D, C, tm_max, tn_max) in cases:
        key, kx, kw, kl = jax.random.split(key, 4)
        x = jax.random.normal(kx, (B, D), dtype=jnp.float32)
        k_init = float(np.sqrt(1.0 / D))
        weight = (2.0 * k_init * jax.random.uniform(kw, (C, D), jnp.float32) - k_init)
        labels = jax.random.randint(kl, (B,), 0, C, dtype=jnp.int32)

        out_cos = jax.block_until_ready(
            arcface_forward(x, weight, m, s, None, tm_max=tm_max, tn_max=tn_max))
        out_arc = jax.block_until_ready(
            arcface_forward(x, weight, m, s, labels, tm_max=tm_max, tn_max=tn_max))

        assert out_cos.shape == (B, C) and out_arc.shape == (B, C)

        # Tight check against a reference with identical bf16 feed (validates tiling/indexing).
        np.testing.assert_allclose(np.asarray(out_cos),
                                   np.asarray(_ref_forward_quant(x, weight, m, s, None)),
                                   atol=1e-4)
        np.testing.assert_allclose(np.asarray(out_arc),
                                   np.asarray(_ref_forward_quant(x, weight, m, s, labels)),
                                   atol=1e-3)

        # Loose check against the exact f32 PyTorch-mirror reference (bf16 MXU feed).
        np.testing.assert_allclose(np.asarray(out_cos),
                                   np.asarray(_ref_forward(x, weight, m, s, None)),
                                   atol=2e-2)
        np.testing.assert_allclose(np.asarray(out_arc),
                                   np.asarray(_ref_forward(x, weight, m, s, labels)),
                                   atol=3e-1)

    print("KERNEL_OK")
</pallas_src>

<mosaic_0001>
module attributes {stable_mosaic.version = 11 : i64} {
  func.func @kernel(%arg0: i32, %arg1: i32, %arg2: memref<8x32xbf16, #tpu.memory_space<vmem>>, %arg3: memref<128x32xbf16, #tpu.memory_space<vmem>>, %arg4: memref<8x1xf32, #tpu.memory_space<vmem>>, %arg5: memref<1x128xf32, #tpu.memory_space<vmem>>, %arg6: memref<8x1xi32, #tpu.memory_space<vmem>>, %arg7: memref<8x128xf32, #tpu.memory_space<vmem>>) attributes {dimension_semantics = [#tpu.dimension_semantics<parallel>, #tpu.dimension_semantics<parallel>], iteration_bounds = array<i64: 1, 1>, scalar_prefetch = 0 : i64, scratch_operands = 0 : i64, tpu.core_type = #tpu.core_type<tc>, window_params = [{transform_indices = @transform_0, window_bounds = array<i64: 8, 32>}, {transform_indices = @transform_1, window_bounds = array<i64: 128, 32>}, {transform_indices = @transform_2, window_bounds = array<i64: 8, 1>}, {transform_indices = @transform_3, window_bounds = array<i64: 1, 128>}, {transform_indices = @transform_4, window_bounds = array<i64: 8, 1>}, {transform_indices = @transform_5, window_bounds = array<i64: 8, 128>}]} {
    %c0 = arith.constant 0 : index
    %c0_0 = arith.constant 0 : index
    %0 = vector.load %arg2[%c0, %c0_0] : memref<8x32xbf16, #tpu.memory_space<vmem>>, vector<8x32xbf16>
    %c0_1 = arith.constant 0 : index
    %c0_2 = arith.constant 0 : index
    %1 = vector.load %arg3[%c0_1, %c0_2] : memref<128x32xbf16, #tpu.memory_space<vmem>>, vector<128x32xbf16>
    %cst = arith.constant dense<0.000000e+00> : vector<8x128xf32>
    %2 = tpu.matmul %0, %1, %cst {dimension_numbers = #tpu.dot_dimension_numbers<[1], [1], [0], [0], [0, 0, 1, 0], [], []>} : vector<8x32xbf16>, vector<128x32xbf16>, vector<8x128xf32> -> vector<8x128xf32>
    %c0_3 = arith.constant 0 : index
    %c0_4 = arith.constant 0 : index
    %3 = vector.load %arg4[%c0_3, %c0_4] : memref<8x1xf32, #tpu.memory_space<vmem>>, vector<8x1xf32>
    %4 = vector.broadcast %3 : vector<8x1xf32> to vector<8x128xf32>
    %5 = arith.mulf %2, %4 : vector<8x128xf32>
    %c0_5 = arith.constant 0 : index
    %c0_6 = arith.constant 0 : index
    %6 = vector.load %arg5[%c0_5, %c0_6] : memref<1x128xf32, #tpu.memory_space<vmem>>, vector<1x128xf32>
    %7 = vector.broadcast %6 : vector<1x128xf32> to vector<8x128xf32>
    %8 = arith.mulf %5, %7 : vector<8x128xf32>
    %c0_7 = arith.constant 0 : index
    %c0_8 = arith.constant 0 : index
    %9 = vector.load %arg7[%c0_7, %c0_8] : memref<8x128xf32, #tpu.memory_space<vmem>>, vector<8x128xf32>
    tpu.vector_store %arg7[%c0_7, %c0_8], %8 {strides = array<i32>} : memref<8x128xf32, #tpu.memory_space<vmem>>, vector<8x128xf32>,
    return
  }
  func.func @transform_0(%arg0: i32, %arg1: i32) -> (i32, i32) {
    %c0_i32 = arith.constant 0 : i32
    %c0_i32_0 = arith.constant 0 : i32
    return %arg0, %c0_i32 : i32, i32
  }
  func.func @transform_1(%arg0: i32, %arg1: i32) -> (i32, i32) {
    %c0_i32 = arith.constant 0 : i32
    %c0_i32_0 = arith.constant 0 : i32
    return %arg1, %c0_i32 : i32, i32
  }
  func.func @transform_2(%arg0: i32, %arg1: i32) -> (i32, i32) {
    %c0_i32 = arith.constant 0 : i32
    %c0_i32_0 = arith.constant 0 : i32
    return %arg0, %c0_i32 : i32, i32
  }
  func.func @transform_3(%arg0: i32, %arg1: i32) -> (i32, i32) {
    %c0_i32 = arith.constant 0 : i32
    %c0_i32_0 = arith.constant 0 : i32
    return %c0_i32, %arg1 : i32, i32
  }
  func.func @transform_4(%arg0: i32, %arg1: i32) -> (i32, i32) {
    %c0_i32 = arith.constant 0 : i32
    %c0_i32_0 = arith.constant 0 : i32
    return %arg0, %c0_i32 : i32, i32
  }
  func.func @transform_5(%arg0: i32, %arg1: i32) -> (i32, i32) {
    %c0_i32 = arith.constant 0 : i32
    return %arg0, %arg1 : i32, i32
  }
}

</mosaic_0001>

<bundles_post_ra>
// kernel: tpu_custom_call.1
= control target key start
LH: loop header
LB: loop body
LE: loop exit
PB: predicated region body
PF: predicated region fallthrough
CT: control target
= control target key end

     0   :  { %v253_v1 = vmov 0.0   ;;  %vm79_vm0 = vcmask 261120   ;;  %vm254_vm1 = vmmov 0   ;;  %v255_v6 = vmov 0   ;;  %s341_s0 = inlined_call_operand.vmem [shape: bf16[8,32], index: 0, kind: input, shape index: {}]   ;;  %s342_s1 = inlined_call_operand.vmem [shape: bf16[128,32], index: 1, kind: input, shape index: {}]   ;;  %s343_s2 = inlined_call_operand.vmem [shape: f32[8,1], index: 2, kind: input, shape index: {}]   ;;  %s344_s3 = inlined_call_operand.vmem [shape: f32[1,128], index: 3, kind: input, shape index: {}]   ;;  %s345_s4 = inlined_call_operand.vmem [shape: s32[8,1], index: 4, kind: input, shape index: {}]   ;;  %s346_s5 = inlined_call_operand.hbm [shape: f32[8,128], index: 5, kind: output, shape index: {}]  }
   0x1   :  { %v221_v0 = vld [vmem:[%s342_s1] sm:$0xff]   ;;  %196 = vmatprep.subr.bf16.mxu0 %v253_v1  ;;  %v222_v3 = vld [vmem:[%s342_s1 + $0x8] sm:$0xff]   ;;  %212 = vmatprep.mubr.msk.bf16.mxu0 %vm254_vm1, %v253_v1 }
   0x2   :  { %v84_v2 = vsel %vm79_vm0, %v221_v0, 0  ;;  %v87_v4 = vsel %vm79_vm0, %v222_v3, 0  ;;  %v147_v5 = vld [vmem:[%s343_s2] sm:$0xff]  ;;  %220 = vset.pattern.permute.xlu0 %v255_v6 }
   0x3   :  { %197 = vmatpush3.bf16.xpose.msra.mxu0 %v84_v2 }
   0x4   :  { %198 = vmatprep.subr.bf16.mxu0 %v253_v1 }
   0x5   :  { %10 = vsyncpa [#allocation3], 0  ;;  %150 = vperm.xlu0 %220, %v147_v5   ;;  %v223_v7 = vld [vmem:[%s342_s1 + $0x10] sm:$0xff]   ;;  %v224_v9 = vld [vmem:[%s342_s1 + $0x18] sm:$0xff]   ;;  %s256_s13 = smov [#allocation2]  }
   0x6   :  { %v90_v8 = vsel %vm79_vm0, %v223_v7, 0  ;;  %v93_v10 = vsel %vm79_vm0, %v224_v9, 0  ;;  %v225_v11 = vld [vmem:[%s342_s1 + $0x20] sm:$0xff]   ;;  %v226_v13 = vld [vmem:[%s342_s1 + $0x28] sm:$0xff]   ;;  %v227_v15 = vld [vmem:[%s342_s1 + $0x30] sm:$0xff]   ;;  %s169_s14 = sshll.u32 %s256_s13, 4  ;;  %s170_s14 = int_to_ptr.vmem [resolvable:$true] %s169_s14 }
   0x7   :  { %v96_v12 = vsel %vm79_vm0, %v225_v11, 0  ;;  %v99_v14 = vsel %vm79_vm0, %v226_v13, 0  ;;  %v102_v16 = vsel %vm79_vm0, %v227_v15, 0  ;;  %v228_v17 = vld [vmem:[%s342_s1 + $0x38] sm:$0xff]   ;;  %v22_v19 = vld [vmem:[%s341_s0] sm:$0xf]  ;;  %p234_p1 = scmp.lt.s32.totalorder %s170_s14, %s170_s14 }
   0x8   :  { %v105_v18 = vsel %vm79_vm0, %v228_v17, 0  ;;  %v186_v22 = vld [vmem:[%s344_s3] ss:$0 sm:$0xff]  ;;  %s229_s1 = scalar_lea.vmem %s170_s14, 128 }
   0x9   :  { %p230_p0 = scmp.ne.s32.totalorder %s170_s14, %s229_s1  ;;  %p235_p2 = scmp.lt.s32.totalorder %s229_s1, %s229_s1 }
   0xb   :  { %199 = vmatpush3.bf16.xpose.msra.mxu0 %v87_v4  ;;  %p236_p3 = por %p235_p2, %p234_p1 }
   0xc   :  { %200 = vmatprep.subr.bf16.mxu0 %v253_v1 }
   0xd   :  { %p237_p4 = pnand %p236_p3, %p230_p0 }
  0x13   :  { %201 = vmatpush3.bf16.xpose.msra.mxu0 %v90_v8 }
  0x14   :  { %202 = vmatprep.subr.bf16.mxu0 %v253_v1 }
  0x1b   :  { %203 = vmatpush3.bf16.xpose.msra.mxu0 %v93_v10 }
  0x1c   :  { %204 = vmatprep.subr.bf16.mxu0 %v253_v1 }
  0x23   :  { %205 = vmatpush3.bf16.xpose.msra.mxu0 %v96_v12 }
  0x24   :  { %206 = vmatprep.subr.bf16.mxu0 %v253_v1 }
  0x2b   :  { %207 = vmatpush3.bf16.xpose.msra.mxu0 %v99_v14 }
  0x2c   :  { %208 = vmatprep.subr.bf16.mxu0 %v253_v1 }
  0x33   :  { %209 = vmatpush3.bf16.xpose.msra.mxu0 %v102_v16 }
  0x34   :  { %210 = vmatprep.subr.bf16.mxu0 %v253_v1 }
  0x3b   :  { %211 = vmatpush3.bf16.xpose.msra.mxu0 %v105_v18 }
  0x42   :  { %213 = vmatmul.mubr.msk.bf16.vlgmr.msra.gmra.mrb[0].mxu0 %vm79_vm0, %v22_v19 }
  0x84   :  { %v151_v20 = vpop.permute.xlu0 %150 }
 0x115   :  { %v141_v21 = vpop.f32.mrb[0].mxu0 }
 0x116   :  { %v153_v23 = vmul.f32 %v151_v20, %v141_v21  ;;  %v214_v24 = vpop.f32.mrb[1].mxu0 }
 0x117   :  { %v144_v25 = vpop.f32.mrb[2].mxu0 }
 0x118   :  { %v215_v26 = vpop.f32.mrb[3].mxu0  ;;  %v161_v27 = vmul.f32 %v186_v22, %v153_v23 }
 0x11a   :  { %162 = vst [vmem:[#allocation2] sm:$0xff] %v161_v27 }
 0x11b   :  { %240 = shalt.err (!%p237_p4)
}
 0x11c   :  { %s241_s3 = scalar_lea.hbm %s346_s5, 128 }
 0x11d   :  { %p242_p5 = scmp.ne.s32.totalorder %s346_s5, %s241_s3  ;;  %p245_p6 = scmp.lt.u32.totalorder %s241_s3, %s346_s5 }
 0x11f   :  { %p247_p7 = pnand %p245_p6, %p242_p5 }
 0x121   :  { %250 = shalt.err (!%p247_p7)
}
 0x122   :  { %172 = dma.vmem_to_hbm [thread:$0]  %s170_s14, 128, %s346_s5, [#allocation3]  }
 0x123   :  { %251 = dma.done.wait [#allocation3], 128  }
 0x124   :  { %252 = vsyncadd [#allocation3], 4294967168 }
 0x125   :  { %176 = vsyncpa [#allocation3], 1 }

</bundles_post_ra>
